<compile_context>
chip_gen: v5e
topology: v5e:2x2
jax: 0.10.0
libtpu: 0.0.40
codegen_flags: <defaults>
</compile_context>

<pallas_src>
import jax
import jax.numpy as jnp
from jax import lax
from jax.experimental import pallas as pl
from jax.experimental.pallas import tpu as pltpu


def lstm_detector_kernel(x_ref, wih_ref, whh_ref, b_ref, wc_ref, bc_ref, out_ref):
    """Single invocation: hoisted input projection + fully-unrolled LSTM + classifier.

    x_ref  : (T, B, I)   time-major input, f32
    wih_ref: (I, 4H)     input->gates weights (i, f, g, o order), bf16 or f32
    whh_ref: (H, 4H)     hidden->gates weights, bf16 or f32
    b_ref  : (1, 4H)     combined bias (b_ih + b_hh), f32
    wc_ref : (1, H)      classifier weight row, f32
    bc_ref : (1, 1)      classifier bias, f32
    out_ref: (B, 1)      logits, f32
    """
    T, B, I = x_ref.shape
    H4 = whh_ref.shape[1]
    H = H4 // 4

    wih = wih_ref[...]
    whh = whh_ref[...]
    mm_dtype = whh.dtype  # MXU operand dtype (bf16 default); accumulation stays f32

    # ---- hoisted input projection: one big MXU matmul, off the serial path ----
    # Bias folded in once here instead of re-broadcast every timestep.
    x_flat = x_ref[...].reshape(T * B, I).astype(mm_dtype)
    xg = (jnp.dot(x_flat, wih, preferred_element_type=jnp.float32)
          + b_ref[...])                                        # (T*B, 4H), f32

    # Activation-select constants, hoisted out of the loop.
    # Lanes [2H, 3H) are the tanh ("g") gate; all other lanes are sigmoid gates,
    # computed through the SAME tanh pass via sigmoid(x) = 0.5*(tanh(x/2) + 1).
    lane = lax.broadcasted_iota(jnp.int32, (B, H4), 1)
    g_mask = (lane >= 2 * H) & (lane < 3 * H)
    g_scale = jnp.where(g_mask, jnp.float32(1.0), jnp.float32(0.5))  # (B, 4H)
    g_off = jnp.where(g_mask, jnp.float32(0.0), jnp.float32(0.5))    # (B, 4H)

    h = jnp.zeros((B, H), jnp.float32)
    c = jnp.zeros((B, H), jnp.float32)

    # ---- fully-unrolled recurrence (T static & small); h/c live in vregs ----
    for t in range(T):
        # TODO(synk): replace per-step jnp.dot with a stationary-RHS MXU sequence
        # (push whh once, acc_lhs/pop per step) once matmul_push_rhs is validated.
        gates = xg[t * B:(t + 1) * B] + jnp.dot(
            h.astype(mm_dtype), whh, preferred_element_type=jnp.float32)  # (B, 4H) f32
        # One EUP pass over the whole (B, 4H) tile; VPU scale/offset does the rest.
        th = jnp.tanh(gates * g_scale)
        act = th * g_scale + g_off          # g lanes: tanh(x); others: sigmoid(x)
        i_g = act[:, 0:H]
        f_g = act[:, H:2 * H]
        g_g = act[:, 2 * H:3 * H]
        o_g = act[:, 3 * H:4 * H]
        c = f_g * c + i_g * g_g
        h = o_g * jnp.tanh(c)

    # ---- classifier Linear(H, 1): VPU multiply + lane reduction (no N=1 MXU trip) ----
    out_ref[...] = (jnp.sum(h * wc_ref[...], axis=-1, keepdims=True)
                    + bc_ref[...])


def prepare_params(params, matmul_dtype=jnp.bfloat16):
    """One-time (model-load) weight prep: transpose, bias fold, MXU-operand cast.

    Keeps the per-inference path down to one transpose + one pallas_call.
    bf16 operands are safe on v5e/v6e/v7x; all elementwise math stays f32 in-kernel.
    """
    return {
        "wih_t": jnp.transpose(params["w_ih"]).astype(matmul_dtype),          # (I, 4H)
        "whh_t": jnp.transpose(params["w_hh"]).astype(matmul_dtype),          # (H, 4H)
        "b": (params["b_ih"] + params["b_hh"])[None, :].astype(jnp.float32),  # (1, 4H)
        "wc": params["w_cls"].astype(jnp.float32),                            # (1, H)
        "bc": params["b_cls"][None, :].astype(jnp.float32),                   # (1, 1)
    }


@jax.jit
def detector_forward(x, prep):
    """x: (B, T, 10) f32, batch_first like the PyTorch module. Returns (B, 1) logits."""
    B, T, I = x.shape
    x_tm = jnp.transpose(x, (1, 0, 2)).astype(jnp.float32)  # (T, B, I) time-major

    out = pl.pallas_call(
        lstm_detector_kernel,
        out_shape=jax.ShapeDtypeStruct((B, 1), jnp.float32),
        in_specs=[pl.BlockSpec(memory_space=pltpu.MemorySpace.VMEM)] * 6,
        out_specs=pl.BlockSpec(memory_space=pltpu.MemorySpace.VMEM),
    )(x_tm, prep["wih_t"], prep["whh_t"], prep["b"], prep["wc"], prep["bc"])
    return out


def detector_reference(x, params):
    """Pure-JAX reference (same math as PyTorch nn.LSTM + nn.Linear)."""
    H = params["w_hh"].shape[1]
    wih_t = jnp.transpose(params["w_ih"])
    whh_t = jnp.transpose(params["w_hh"])
    b = params["b_ih"] + params["b_hh"]
    B = x.shape[0]

    def step(carry, x_t):
        h, c = carry
        gates = x_t @ wih_t + h @ whh_t + b
        i = jax.nn.sigmoid(gates[:, 0:H])
        f = jax.nn.sigmoid(gates[:, H:2 * H])
        g = jnp.tanh(gates[:, 2 * H:3 * H])
        o = jax.nn.sigmoid(gates[:, 3 * H:4 * H])
        c = f * c + i * g
        h = o * jnp.tanh(c)
        return (h, c), None

    h0 = jnp.zeros((B, H), jnp.float32)
    (h_last, _), _ = lax.scan(step, (h0, h0), jnp.transpose(x, (1, 0, 2)))
    return h_last @ jnp.transpose(params["w_cls"]) + params["b_cls"][None, :]


def init_params(key, hidden=32, input_size=10):
    """Deterministic init mimicking PyTorch's U(-1/sqrt(H), 1/sqrt(H))."""
    k = 1.0 / jnp.sqrt(jnp.float32(hidden))
    keys = jax.random.split(key, 6)
    u = lambda kk, shape: jax.random.uniform(kk, shape, jnp.float32, -k, k)
    return {
        "w_ih": u(keys[0], (4 * hidden, input_size)),
        "w_hh": u(keys[1], (4 * hidden, hidden)),
        "b_ih": u(keys[2], (4 * hidden,)),
        "b_hh": u(keys[3], (4 * hidden,)),
        "w_cls": u(keys[4], (1, hidden)),
        "b_cls": u(keys[5], (1,)),
    }


if __name__ == "__main__":
    B, T, I, H = 8, 8, 10, 32  # small shapes; input_size=10 fixed by the module
    key = jax.random.PRNGKey(0)
    kx, kp = jax.random.split(key)
    x = jax.random.normal(kx, (B, T, I), jnp.float32)
    params = init_params(kp, hidden=H, input_size=I)

    ref = detector_reference(x, params)

    # f32 MXU operands: exact-path check (also validates the one-pass tanh identity).
    prep_f32 = prepare_params(params, matmul_dtype=jnp.float32)
    out_f32 = jax.block_until_ready(detector_forward(x, prep_f32))
    assert out_f32.shape == (B, 1)
    assert jnp.allclose(out_f32, ref, atol=1e-4, rtol=1e-4), (out_f32, ref)

    # Default path: bf16 MXU operands (valid on v5e/v6e/v7x), f32 accumulation.
    prep_bf16 = prepare_params(params)
    out_bf16 = jax.block_until_ready(detector_forward(x, prep_bf16))
    assert out_bf16.shape == (B, 1)
    assert jnp.allclose(out_bf16, ref, atol=5e-2, rtol=5e-2), (out_bf16, ref)

    print("KERNEL_OK")
</pallas_src>

<mosaic_0001>
module attributes {stable_mosaic.version = 11 : i64} {
  func.func @lstm_detector_kernel(%arg0: memref<8x8x10xf32, #tpu.memory_space<vmem>>, %arg1: memref<10x128xf32, #tpu.memory_space<vmem>>, %arg2: memref<32x128xf32, #tpu.memory_space<vmem>>, %arg3: memref<1x128xf32, #tpu.memory_space<vmem>>, %arg4: memref<1x32xf32, #tpu.memory_space<vmem>>, %arg5: memref<1x1xf32, #tpu.memory_space<vmem>>, %arg6: memref<8x1xf32, #tpu.memory_space<vmem>>) attributes {dimension_semantics = [], scalar_prefetch = 0 : i64, scratch_operands = 0 : i64, tpu.core_type = #tpu.core_type<tc>} {
    %c0 = arith.constant 0 : index
    %c0_0 = arith.constant 0 : index
    %0 = vector.load %arg1[%c0, %c0_0] : memref<10x128xf32, #tpu.memory_space<vmem>>, vector<10x128xf32>
    %c0_1 = arith.constant 0 : index
    %c0_2 = arith.constant 0 : index
    %1 = vector.load %arg2[%c0_1, %c0_2] : memref<32x128xf32, #tpu.memory_space<vmem>>, vector<32x128xf32>
    %c0_3 = arith.constant 0 : index
    %c0_4 = arith.constant 0 : index
    %c0_5 = arith.constant 0 : index
    %2 = vector.load %arg0[%c0_3, %c0_4, %c0_5] : memref<8x8x10xf32, #tpu.memory_space<vmem>>, vector<8x8x10xf32>
    %3 = vector.shape_cast %2 : vector<8x8x10xf32> to vector<64x10xf32>
    %cst = arith.constant dense<0.000000e+00> : vector<64x128xf32>
    %4 = tpu.matmul %3, %0, %cst {dimension_numbers = #tpu.dot_dimension_numbers<[1], [0], [0], [1], [0, 0, 1, 1], [], []>} : vector<64x10xf32>, vector<10x128xf32>, vector<64x128xf32> -> vector<64x128xf32>
    %c0_6 = arith.constant 0 : index
    %c0_7 = arith.constant 0 : index
    %5 = vector.load %arg3[%c0_6, %c0_7] : memref<1x128xf32, #tpu.memory_space<vmem>>, vector<1x128xf32>
    %6 = vector.broadcast %5 : vector<1x128xf32> to vector<64x128xf32>
    %7 = arith.addf %4, %6 : vector<64x128xf32>
    %8 = tpu.iota {dimensions = array<i32: 1>} : vector<8x128xi32>
    %c64_i32 = arith.constant 64 : i32
    %9 = vector.broadcast %c64_i32 : i32 to vector<8x128xi32>
    %10 = arith.cmpi sge, %8, %9 : vector<8x128xi32>
    %c96_i32 = arith.constant 96 : i32
    %11 = vector.broadcast %c96_i32 : i32 to vector<8x128xi32>
    %12 = arith.cmpi slt, %8, %11 : vector<8x128xi32>
    %13 = arith.andi %10, %12 : vector<8x128xi1>
    %cst_8 = arith.constant 1.000000e+00 : f32
    %cst_9 = arith.constant 5.000000e-01 : f32
    %14 = vector.broadcast %cst_8 : f32 to vector<8x128xf32>
    %15 = vector.broadcast %cst_9 : f32 to vector<8x128xf32>
    %16 = arith.select %13, %14, %15 : vector<8x128xi1>, vector<8x128xf32>
    %cst_10 = arith.constant 0.000000e+00 : f32
    %cst_11 = arith.constant 5.000000e-01 : f32
    %17 = vector.broadcast %cst_10 : f32 to vector<8x128xf32>
    %18 = vector.broadcast %cst_11 : f32 to vector<8x128xf32>
    %19 = arith.select %13, %17, %18 : vector<8x128xi1>, vector<8x128xf32>
    %cst_12 = arith.constant 0.000000e+00 : f32
    %20 = vector.broadcast %cst_12 : f32 to vector<8x32xf32>
    %cst_13 = arith.constant 0.000000e+00 : f32
    %21 = vector.broadcast %cst_13 : f32 to vector<8x32xf32>
    %22 = vector.extract_strided_slice %7 {offsets = [0, 0], sizes = [8, 128], strides = [1, 1]} : vector<64x128xf32> to vector<8x128xf32>
    %cst_14 = arith.constant dense<0.000000e+00> : vector<8x128xf32>
    %23 = tpu.matmul %20, %1, %cst_14 {dimension_numbers = #tpu.dot_dimension_numbers<[1], [0], [0], [1], [0, 0, 1, 1], [], []>} : vector<8x32xf32>, vector<32x128xf32>, vector<8x128xf32> -> vector<8x128xf32>
    %24 = arith.addf %22, %23 : vector<8x128xf32>
    %25 = arith.mulf %24, %16 : vector<8x128xf32>
    %26 = math.tanh %25 : vector<8x128xf32>
    %27 = arith.mulf %26, %16 : vector<8x128xf32>
    %28 = arith.addf %27, %19 : vector<8x128xf32>
    %29 = vector.extract_strided_slice %28 {offsets = [0, 0], sizes = [8, 32], strides = [1, 1]} : vector<8x128xf32> to vector<8x32xf32>
    %30 = vector.extract_strided_slice %28 {offsets = [0, 32], sizes = [8, 32], strides = [1, 1]} : vector<8x128xf32> to vector<8x32xf32>
    %31 = vector.extract_strided_slice %28 {offsets = [0, 64], sizes = [8, 32], strides = [1, 1]} : vector<8x128xf32> to vector<8x32xf32>
    %32 = vector.extract_strided_slice %28 {offsets = [0, 96], sizes = [8, 32], strides = [1, 1]} : vector<8x128xf32> to vector<8x32xf32>
    %33 = arith.mulf %30, %21 : vector<8x32xf32>
    %34 = arith.mulf %29, %31 : vector<8x32xf32>
    %35 = arith.addf %33, %34 : vector<8x32xf32>
    %36 = math.tanh %35 : vector<8x32xf32>
    %37 = arith.mulf %32, %36 : vector<8x32xf32>
    %38 = vector.extract_strided_slice %7 {offsets = [8, 0], sizes = [8, 128], strides = [1, 1]} : vector<64x128xf32> to vector<8x128xf32>
    %cst_15 = arith.constant dense<0.000000e+00> : vector<8x128xf32>
    %39 = tpu.matmul %37, %1, %cst_15 {dimension_numbers = #tpu.dot_dimension_numbers<[1], [0], [0], [1], [0, 0, 1, 1], [], []>} : vector<8x32xf32>, vector<32x128xf32>, vector<8x128xf32> -> vector<8x128xf32>
    %40 = arith.addf %38, %39 : vector<8x128xf32>
    %41 = arith.mulf %40, %16 : vector<8x128xf32>
    %42 = math.tanh %41 : vector<8x128xf32>
    %43 = arith.mulf %42, %16 : vector<8x128xf32>
    %44 = arith.addf %43, %19 : vector<8x128xf32>
    %45 = vector.extract_strided_slice %44 {offsets = [0, 0], sizes = [8, 32], strides = [1, 1]} : vector<8x128xf32> to vector<8x32xf32>
    %46 = vector.extract_strided_slice %44 {offsets = [0, 32], sizes = [8, 32], strides = [1, 1]} : vector<8x128xf32> to vector<8x32xf32>
    %47 = vector.extract_strided_slice %44 {offsets = [0, 64], sizes = [8, 32], strides = [1, 1]} : vector<8x128xf32> to vector<8x32xf32>
    %48 = vector.extract_strided_slice %44 {offsets = [0, 96], sizes = [8, 32], strides = [1, 1]} : vector<8x128xf32> to vector<8x32xf32>
    %49 = arith.mulf %46, %35 : vector<8x32xf32>
    %50 = arith.mulf %45, %47 : vector<8x32xf32>
    %51 = arith.addf %49, %50 : vector<8x32xf32>
    %52 = math.tanh %51 : vector<8x32xf32>
    %53 = arith.mulf %48, %52 : vector<8x32xf32>
    %54 = vector.extract_strided_slice %7 {offsets = [16, 0], sizes = [8, 128], strides = [1, 1]} : vector<64x128xf32> to vector<8x128xf32>
    %cst_16 = arith.constant dense<0.000000e+00> : vector<8x128xf32>
    %55 = tpu.matmul %53, %1, %cst_16 {dimension_numbers = #tpu.dot_dimension_numbers<[1], [0], [0], [1], [0, 0, 1, 1], [], []>} : vector<8x32xf32>, vector<32x128xf32>, vector<8x128xf32> -> vector<8x128xf32>
    %56 = arith.addf %54, %55 : vector<8x128xf32>
    %57 = arith.mulf %56, %16 : vector<8x128xf32>
    %58 = math.tanh %57 : vector<8x128xf32>
    %59 = arith.mulf %58, %16 : vector<8x128xf32>
    %60 = arith.addf %59, %19 : vector<8x128xf32>
    %61 = vector.extract_strided_slice %60 {offsets = [0, 0], sizes = [8, 32], strides = [1, 1]} : vector<8x128xf32> to vector<8x32xf32>
    %62 = vector.extract_strided_slice %60 {offsets = [0, 32], sizes = [8, 32], strides = [1, 1]} : vector<8x128xf32> to vector<8x32xf32>
    %63 = vector.extract_strided_slice %60 {offsets = [0, 64], sizes = [8, 32], strides = [1, 1]} : vector<8x128xf32> to vector<8x32xf32>
    %64 = vector.extract_strided_slice %60 {offsets = [0, 96], sizes = [8, 32], strides = [1, 1]} : vector<8x128xf32> to vector<8x32xf32>
    %65 = arith.mulf %62, %51 : vector<8x32xf32>
    %66 = arith.mulf %61, %63 : vector<8x32xf32>
    %67 = arith.addf %65, %66 : vector<8x32xf32>
    %68 = math.tanh %67 : vector<8x32xf32>
    %69 = arith.mulf %64, %68 : vector<8x32xf32>
    %70 = vector.extract_strided_slice %7 {offsets = [24, 0], sizes = [8, 128], strides = [1, 1]} : vector<64x128xf32> to vector<8x128xf32>
    %cst_17 = arith.constant dense<0.000000e+00> : vector<8x128xf32>
    %71 = tpu.matmul %69, %1, %cst_17 {dimension_numbers = #tpu.dot_dimension_numbers<[1], [0], [0], [1], [0, 0, 1, 1], [], []>} : vector<8x32xf32>, vector<32x128xf32>, vector<8x128xf32> -> vector<8x128xf32>
    %72 = arith.addf %70, %71 : vector<8x128xf32>
    %73 = arith.mulf %72, %16 : vector<8x128xf32>
    %74 = math.tanh %73 : vector<8x128xf32>
    %75 = arith.mulf %74, %16 : vector<8x128xf32>
    %76 = arith.addf %75, %19 : vector<8x128xf32>
    %77 = vector.extract_strided_slice %76 {offsets = [0, 0], sizes = [8, 32], strides = [1, 1]} : vector<8x128xf32> to vector<8x32xf32>
    %78 = vector.extract_strided_slice %76 {offsets = [0, 32], sizes = [8, 32], strides = [1, 1]} : vector<8x128xf32> to vector<8x32xf32>
    %79 = vector.extract_strided_slice %76 {offsets = [0, 64], sizes = [8, 32], strides = [1, 1]} : vector<8x128xf32> to vector<8x32xf32>
    %80 = vector.extract_strided_slice %76 {offsets = [0, 96], sizes = [8, 32], strides = [1, 1]} : vector<8x128xf32> to vector<8x32xf32>
    %81 = arith.mulf %78, %67 : vector<8x32xf32>
    %82 = arith.mulf %77, %79 : vector<8x32xf32>
    %83 = arith.addf %81, %82 : vector<8x32xf32>
    %84 = math.tanh %83 : vector<8x32xf32>
    %85 = arith.mulf %80, %84 : vector<8x32xf32>
    %86 = vector.extract_strided_slice %7 {offsets = [32, 0], sizes = [8, 128], strides = [1, 1]} : vector<64x128xf32> to vector<8x128xf32>
    %cst_18 = arith.constant dense<0.000000e+00> : vector<8x128xf32>
    %87 = tpu.matmul %85, %1, %cst_18 {dimension_numbers = #tpu.dot_dimension_numbers<[1], [0], [0], [1], [0, 0, 1, 1], [], []>} : vector<8x32xf32>, vector<32x128xf32>, vector<8x128xf32> -> vector<8x128xf32>
    %88 = arith.addf %86, %87 : vector<8x128xf32>
    %89 = arith.mulf %88, %16 : vector<8x128xf32>
    %90 = math.tanh %89 : vector<8x128xf32>
    %91 = arith.mulf %90, %16 : vector<8x128xf32>
    %92 = arith.addf %91, %19 : vector<8x128xf32>
    %93 = vector.extract_strided_slice %92 {offsets = [0, 0], sizes = [8, 32], strides = [1, 1]} : vector<8x128xf32> to vector<8x32xf32>
    %94 = vector.extract_strided_slice %92 {offsets = [0, 32], sizes = [8, 32], strides = [1, 1]} : vector<8x128xf32> to vector<8x32xf32>
    %95 = vector.extract_strided_slice %92 {offsets = [0, 64], sizes = [8, 32], strides = [1, 1]} : vector<8x128xf32> to vector<8x32xf32>
    %96 = vector.extract_strided_slice %92 {offsets = [0, 96], sizes = [8, 32], strides = [1, 1]} : vector<8x128xf32> to vector<8x32xf32>
    %97 = arith.mulf %94, %83 : vector<8x32xf32>
    %98 = arith.mulf %93, %95 : vector<8x32xf32>
    %99 = arith.addf %97, %98 : vector<8x32xf32>
    %100 = math.tanh %99 : vector<8x32xf32>
    %101 = arith.mulf %96, %100 : vector<8x32xf32>
    %102 = vector.extract_strided_slice %7 {offsets = [40, 0], sizes = [8, 128], strides = [1, 1]} : vector<64x128xf32> to vector<8x128xf32>
    %cst_19 = arith.constant dense<0.000000e+00> : vector<8x128xf32>
    %103 = tpu.matmul %101, %1, %cst_19 {dimension_numbers = #tpu.dot_dimension_numbers<[1], [0], [0], [1], [0, 0, 1, 1], [], []>} : vector<8x32xf32>, vector<32x128xf32>, vector<8x128xf32> -> vector<8x128xf32>
    %104 = arith.addf %102, %103 : vector<8x128xf32>
    %105 = arith.mulf %104, %16 : vector<8x128xf32>
    %106 = math.tanh %105 : vector<8x128xf32>
    %107 = arith.mulf %106, %16 : vector<8x128xf32>
    %108 = arith.addf %107, %19 : vector<8x128xf32>
    %109 = vector.extract_strided_slice %108 {offsets = [0, 0], sizes = [8, 32], strides = [1, 1]} : vector<8x128xf32> to vector<8x32xf32>
    %110 = vector.extract_strided_slice %108 {offsets = [0, 32], sizes = [8, 32], strides = [1, 1]} : vector<8x128xf32> to vector<8x32xf32>
    %111 = vector.extract_strided_slice %108 {offsets = [0, 64], sizes = [8, 32], strides = [1, 1]} : vector<8x128xf32> to vector<8x32xf32>
    %112 = vector.extract_strided_slice %108 {offsets = [0, 96], sizes = [8, 32], strides = [1, 1]} : vector<8x128xf32> to vector<8x32xf32>
    %113 = arith.mulf %110, %99 : vector<8x32xf32>
    %114 = arith.mulf %109, %111 : vector<8x32xf32>
    %115 = arith.addf %113, %114 : vector<8x32xf32>
    %116 = math.tanh %115 : vector<8x32xf32>
    %117 = arith.mulf %112, %116 : vector<8x32xf32>
    %118 = vector.extract_strided_slice %7 {offsets = [48, 0], sizes = [8, 128], strides = [1, 1]} : vector<64x128xf32> to vector<8x128xf32>
    %cst_20 = arith.constant dense<0.000000e+00> : vector<8x128xf32>
    %119 = tpu.matmul %117, %1, %cst_20 {dimension_numbers = #tpu.dot_dimension_numbers<[1], [0], [0], [1], [0, 0, 1, 1], [], []>} : vector<8x32xf32>, vector<32x128xf32>, vector<8x128xf32> -> vector<8x128xf32>
    %120 = arith.addf %118, %119 : vector<8x128xf32>
    %121 = arith.mulf %120, %16 : vector<8x128xf32>
    %122 = math.tanh %121 : vector<8x128xf32>
    %123 = arith.mulf %122, %16 : vector<8x128xf32>
    %124 = arith.addf %123, %19 : vector<8x128xf32>
    %125 = vector.extract_strided_slice %124 {offsets = [0, 0], sizes = [8, 32], strides = [1, 1]} : vector<8x128xf32> to vector<8x32xf32>
    %126 = vector.extract_strided_slice %124 {offsets = [0, 32], sizes = [8, 32], strides = [1, 1]} : vector<8x128xf32> to vector<8x32xf32>
    %127 = vector.extract_strided_slice %124 {offsets = [0, 64], sizes = [8, 32], strides = [1, 1]} : vector<8x128xf32> to vector<8x32xf32>
    %128 = vector.extract_strided_slice %124 {offsets = [0, 96], sizes = [8, 32], strides = [1, 1]} : vector<8x128xf32> to vector<8x32xf32>
    %129 = arith.mulf %126, %115 : vector<8x32xf32>
    %130 = arith.mulf %125, %127 : vector<8x32xf32>
    %131 = arith.addf %129, %130 : vector<8x32xf32>
    %132 = math.tanh %131 : vector<8x32xf32>
    %133 = arith.mulf %128, %132 : vector<8x32xf32>
    %134 = vector.extract_strided_slice %7 {offsets = [56, 0], sizes = [8, 128], strides = [1, 1]} : vector<64x128xf32> to vector<8x128xf32>
    %cst_21 = arith.constant dense<0.000000e+00> : vector<8x128xf32>
    %135 = tpu.matmul %133, %1, %cst_21 {dimension_numbers = #tpu.dot_dimension_numbers<[1], [0], [0], [1], [0, 0, 1, 1], [], []>} : vector<8x32xf32>, vector<32x128xf32>, vector<8x128xf32> -> vector<8x128xf32>
    %136 = arith.addf %134, %135 : vector<8x128xf32>
    %137 = arith.mulf %136, %16 : vector<8x128xf32>
    %138 = math.tanh %137 : vector<8x128xf32>
    %139 = arith.mulf %138, %16 : vector<8x128xf32>
    %140 = arith.addf %139, %19 : vector<8x128xf32>
    %141 = vector.extract_strided_slice %140 {offsets = [0, 0], sizes = [8, 32], strides = [1, 1]} : vector<8x128xf32> to vector<8x32xf32>
    %142 = vector.extract_strided_slice %140 {offsets = [0, 32], sizes = [8, 32], strides = [1, 1]} : vector<8x128xf32> to vector<8x32xf32>
    %143 = vector.extract_strided_slice %140 {offsets = [0, 64], sizes = [8, 32], strides = [1, 1]} : vector<8x128xf32> to vector<8x32xf32>
    %144 = vector.extract_strided_slice %140 {offsets = [0, 96], sizes = [8, 32], strides = [1, 1]} : vector<8x128xf32> to vector<8x32xf32>
    %145 = arith.mulf %142, %131 : vector<8x32xf32>
    %146 = arith.mulf %141, %143 : vector<8x32xf32>
    %147 = arith.addf %145, %146 : vector<8x32xf32>
    %148 = math.tanh %147 : vector<8x32xf32>
    %149 = arith.mulf %144, %148 : vector<8x32xf32>
    %c0_22 = arith.constant 0 : index
    %c0_23 = arith.constant 0 : index
    %150 = vector.load %arg4[%c0_22, %c0_23] : memref<1x32xf32, #tpu.memory_space<vmem>>, vector<1x32xf32>
    %151 = vector.broadcast %150 : vector<1x32xf32> to vector<8x32xf32>
    %152 = arith.mulf %149, %151 : vector<8x32xf32>
    %cst_24 = arith.constant dense<0.000000e+00> : vector<8xf32>
    %153 = vector.multi_reduction <add>, %152, %cst_24 [1] : vector<8x32xf32> to vector<8xf32>
    %154 = vector.shape_cast %153 : vector<8xf32> to vector<8x1xf32>
    %c0_25 = arith.constant 0 : index
    %c0_26 = arith.constant 0 : index
    %155 = vector.load %arg5[%c0_25, %c0_26] : memref<1x1xf32, #tpu.memory_space<vmem>>, vector<1x1xf32>
    %156 = vector.broadcast %155 : vector<1x1xf32> to vector<8x1xf32>
    %157 = arith.addf %154, %156 : vector<8x1xf32>
    %c0_27 = arith.constant 0 : index
    %c0_28 = arith.constant 0 : index
    %158 = vector.load %arg6[%c0_27, %c0_28] : memref<8x1xf32, #tpu.memory_space<vmem>>, vector<8x1xf32>
    tpu.vector_store %arg6[%c0_27, %c0_28], %157 {strides = array<i32>} : memref<8x1xf32, #tpu.memory_space<vmem>>, vector<8x1xf32>,
    return
  }
}

</mosaic_0001>

<bundles_post_ra>
// kernel: detector_forward.1
= control target key start
LH: loop header
LB: loop body
LE: loop exit
PB: predicated region body
PF: predicated region fallthrough
CT: control target
= control target key end

     0   :  { %vm68_vm0 = vcmask 1041408   ;;  %vm43_vm1 = vcmask 80896   ;;  %v578_v7 = vmov 0.0   ;;  %v113_v8 = vlaneseq  ;;  %s581_s11 = smov 32   ;;  %s582_s27 = smov 96   ;;  %s807_s2 = inlined_call_operand.vmem [shape: f32[32,128], index: 2, kind: input, shape index: {}]   ;;  %s808_s1 = inlined_call_operand.vmem [shape: f32[10,128], index: 1, kind: input, shape index: {}]   ;;  %s809_s0 = inlined_call_operand.vmem [shape: f32[8,8,10], index: 0, kind: input, shape index: {}]   ;;  %s810_s3 = inlined_call_operand.vmem [shape: f32[1,128], index: 3, kind: input, shape index: {}]   ;;  %s811_s4 = inlined_call_operand.vmem [shape: f32[1,32], index: 4, kind: input, shape index: {}]   ;;  %s812_s5 = inlined_call_operand.<no memory space> [shape: f32[1,1], index: 5, kind: input, shape index: {}]   ;;  %s813_s6 = inlined_call_operand.vmem [shape: f32[8,1], index: 6, kind: output, shape index: {}]  }
   0x1   :  { %v621_v0 = vld [vmem:[%s807_s2 + $0x18] sm:$0xff]  ;;  %v26_v1 = vld [vmem:[%s808_s1 + $0x8] sm:$0x3]  ;;  %v629_v2 = vld [vmem:[%s807_s2 + $0x10] sm:$0xff]  ;;  %v579_v13 = vmov 0.5   ;;  %vm120_vm5 = vcmask 261120  }
   0x2   :  { %136 = vmatpush.msra.mxu1 %v621_v0  ;;  %520 = vmatpush.msk.msra.mxu0 %vm68_vm0, %v26_v1  ;;  %v25_v3 = vld [vmem:[%s808_s1] sm:$0xff]  ;;  %v641_v5 = vld [vmem:[%s807_s2 + $0x8] sm:$0xff]  ;;  %v114_v9 = vand.u32 127, %v113_v8  ;;  %v37_v47 = vld [vmem:[%s809_s0 + $0x30] sm:$0xff]  ;;  %vm514_vm6 = vcmask 7168  }
   0x3   :  { %v31_v4 = vld [vmem:[%s809_s0] sm:$0xff]  ;;  %183 = vmatpush.msra.mxu2 %v621_v0  ;;  %536 = vmatpush.msk.msra.mxu3 %vm68_vm0, %v26_v1  ;;  %v32_v30 = vld [vmem:[%s809_s0 + $0x8] sm:$0xff]  ;;  %v38_v48 = vld [vmem:[%s809_s0 + $0x38] sm:$0xff] }
   0x4   :  { %137 = vmatpush.msra.mxu1 %v629_v2  ;;  %87 = vmatpush.msra.mxu0 %v25_v3  ;;  %v649_v6 = vld [vmem:[%s807_s2] sm:$0xff]  ;;  %vm115_vm2 = vcmp.ge.s32.totalorder %v114_v9, 64  ;;  %vm116_vm3 = vcmp.lt.s32.totalorder %v114_v9, 96  ;;  %v36_v46 = vld [vmem:[%s809_s0 + $0x28] sm:$0xff]  ;;  %v33_v51 = vld [vmem:[%s809_s0 + $0x10] sm:$0xff] }
   0x5   :  { %521 = vmatmul.msk.f32.vlgmr.msra.gmra.mxu0 %vm43_vm1, %v31_v4  ;;  %184 = vmatpush.msra.mxu2 %v629_v2  ;;  %v675_v10 = vld [vmem:[%s810_s3] ss:$0 sm:$0xff]  ;;  %vm117_vm4 = vmand %vm115_vm2, %vm116_vm3  ;;  %s580_s3 = smov 64  }
   0x6   :  { %138 = vmatpush.msra.mxu1 %v641_v5  ;;  %537 = vmatpush.msra.mxu3 %v25_v3  ;;  %v678_v14 = vsel %vm117_vm4, 1.0, %v579_v13  ;;  %v681_v19 = vsel %vm117_vm4, 0.0, %v579_v13 }
   0x7   :  { %185 = vmatpush.msra.mxu2 %v641_v5  ;;  %526 = vmatmul.msk.f32.vlgmr.msra.gmra.mxu3 %vm43_vm1, %v36_v46 }
   0x8   :  { %230 = vmatpush.msrb.mxu3 %v621_v0  ;;  %139 = vmatpush.msra.mxu1 %v649_v6 }
   0x9   :  { %140 = vmatmul.f32.vlgmr.msra.gmra.mxu1 %v578_v7  ;;  %186 = vmatpush.msra.mxu2 %v649_v6 }
   0xa   :  { %231 = vmatpush.msrb.mxu3 %v629_v2  ;;  %277 = vmatpush.msrb.mxu1 %v621_v0 }
   0xb   :  { %324 = vmatpush.msrb.mxu2 %v621_v0 }
   0xc   :  { %232 = vmatpush.msrb.mxu3 %v641_v5  ;;  %278 = vmatpush.msrb.mxu1 %v629_v2 }
   0xd   :  { %325 = vmatpush.msrb.mxu2 %v629_v2  ;;  %522 = vmatmul.msk.f32.gmra.mxu0 %vm43_vm1, %v32_v30 }
   0xe   :  { %233 = vmatpush.msrb.mxu3 %v649_v6  ;;  %279 = vmatpush.msrb.mxu1 %v641_v5 }
   0xf   :  { %326 = vmatpush.msrb.mxu2 %v641_v5  ;;  %527 = vmatmul.msk.f32.gmra.mxu3 %vm43_vm1, %v37_v47 }
  0x10   :  { %280 = vmatpush.msrb.mxu1 %v649_v6  ;;  %371 = vmatpush.msra.mxu3 %v621_v0 }
  0x11   :  { %327 = vmatpush.msrb.mxu2 %v649_v6 }
  0x12   :  { %418 = vmatpush.msra.mxu1 %v621_v0  ;;  %372 = vmatpush.msra.mxu3 %v629_v2 }
  0x14   :  { %419 = vmatpush.msra.mxu1 %v629_v2  ;;  %373 = vmatpush.msra.mxu3 %v641_v5 }
  0x15   :  { %523 = vmatmul.msk.f32.gmra.mxu0 %vm43_vm1, %v33_v51 }
  0x16   :  { %420 = vmatpush.msra.mxu1 %v641_v5  ;;  %374 = vmatpush.msra.mxu3 %v649_v6 }
  0x17   :  { %528 = vmatmul.msk.f32.gmra.mxu3 %vm43_vm1, %v38_v48 }
  0x18   :  { %421 = vmatpush.msra.mxu1 %v649_v6 }
  0x82   :  { %v89_v11 = vpop.f32.mrf.mxu0 }
  0x83   :  { %v90_v12 = vadd.f32 %v675_v10, %v89_v11 }
  0x86   :  { %v141_v15 = vpop.f32.mrf.mxu1 }
  0x87   :  { %v144_v16 = vadd.f32 %v141_v15, %v90_v12 }
  0x89   :  { %v145_v17 = vmul.f32 %v144_v16, %v678_v14 }
  0x8a   :  { %v92_v32 = vpop.f32.mrf.mxu0  ;;  %v727_v53 = vpop.f32.mrf.mxu3 }
  0x8b   :  { %546 = vtanh.f32 %v145_v17  ;;  %v93_v33 = vadd.f32 %v675_v10, %v92_v32  ;;  %v105_v48 = vadd.f32 %v675_v10, %v727_v53 }
  0x91   :  { %v547_v18 = vpop.eup %546 }
  0x92   :  { %v147_v20 = vmul.f32 %v547_v18, %v678_v14  ;;  %v729_v54 = vpop.f32.mrf.mxu3  ;;  %v95_v56 = vpop.f32.mrf.mxu0 }
  0x93   :  { %v96_v57 = vadd.f32 %v675_v10, %v95_v56 }
  0x94   :  { %v148_v21 = vadd.f32 %v147_v20, %v681_v19 }
  0x96   :  { %151 = vrot.lane.b32.xlu0 %v148_v21, %s580_s3  ;;  %v149_v24 = vmul.f32 0.0, %v148_v21 }
  0x9a   :  { %v731_v55 = vpop.f32.mrf.mxu3 }
 0x108   :  { %v152_v22 = vpop.permute.xlu0 %151 }
 0x109   :  { %v154_v23 = vmul.f32 %v152_v22, %v148_v21 }
 0x10b   :  { %156 = vrot.lane.b32.xlu0 %v154_v23, %s581_s11 }
 0x17d   :  { %v157_v25 = vpop.permute.xlu0 %156 }
 0x17e   :  { %v159_v26 = vadd.f32 %v157_v25, %v149_v24 }
 0x180   :  { %548 = vtanh.f32 %v159_v26 }
 0x186   :  { %v549_v27 = vpop.eup %548 }
 0x187   :  { %162 = vrot.lane.b32.xlu1 %v549_v27, %s580_s3 }
 0x1f9   :  { %v163_v28 = vpop.permute.xlu1 %162 }
 0x1fa   :  { %v165_v29 = vmul.f32 %v163_v28, %v148_v21 }
 0x1fc   :  { %167 = vrot.lane.b32.xlu1 %v165_v29, %s581_s11  ;;  %v35_v29 = vld [vmem:[%s809_s0 + $0x20] sm:$0xff] }
 0x26e   :  { %v168_v31 = vpop.permute.xlu1 %167 }
 0x26f   :  { %529 = vmatmul.msk.f32.vlgmr.msra.gmra.mxu2 %vm120_vm5, %v168_v31 }
 0x270   :  { %465 = vmatpush.msra.mxu2 %v621_v0 }
 0x272   :  { %466 = vmatpush.msra.mxu2 %v629_v2 }
 0x274   :  { %467 = vmatpush.msra.mxu2 %v641_v5 }
 0x276   :  { %468 = vmatpush.msra.mxu2 %v649_v6  ;;  %v34_v6 = vld [vmem:[%s809_s0 + $0x18] sm:$0xff] }
 0x277   :  { %524 = vmatmul.msk.f32.gmra.mxu0 %vm43_vm1, %v34_v6 }
 0x27f   :  { %525 = vmatmul.msk.f32.gmra.mxu0 %vm43_vm1, %v35_v29 }
 0x2f2   :  { %v188_v34 = vpop.f32.mrf.mxu2 }
 0x2f3   :  { %v191_v35 = vadd.f32 %v188_v34, %v93_v33 }
 0x2f4   :  { %v98_v11 = vpop.f32.mrf.mxu0 }
 0x2f5   :  { %v192_v36 = vmul.f32 %v191_v35, %v678_v14  ;;  %v99_v12 = vadd.f32 %v675_v10, %v98_v11 }
 0x2f7   :  { %550 = vtanh.f32 %v192_v36 }
 0x2fc   :  { %v101_v31 = vpop.f32.mrf.mxu0 }
 0x2fd   :  { %v551_v37 = vpop.eup %550  ;;  %v102_v32 = vadd.f32 %v675_v10, %v101_v31 }
 0x2fe   :  { %v194_v38 = vmul.f32 %v551_v37, %v678_v14 }
 0x300   :  { %v195_v39 = vadd.f32 %v194_v38, %v681_v19 }
 0x302   :  { %198 = vrot.lane.b32.xlu2 %v195_v39, %s580_s3  ;;  %v196_v42 = vmul.f32 %v195_v39, %v159_v26 }
 0x35c   :  { %v199_v40 = vpop.permute.xlu2 %198 }
 0x35d   :  { %v201_v41 = vmul.f32 %v199_v40, %v195_v39 }
 0x35f   :  { %203 = vrot.lane.b32.xlu2 %v201_v41, %s581_s11 }
 0x3b9   :  { %v204_v43 = vpop.permute.xlu2 %203 }
 0x3ba   :  { %v206_v44 = vadd.f32 %v204_v43, %v196_v42 }
 0x3bc   :  { %552 = vtanh.f32 %v206_v44 }
 0x3c2   :  { %v553_v45 = vpop.eup %552 }
 0x3c3   :  { %209 = vrot.lane.b32.xlu0 %v553_v45, %s580_s3 }
 0x435   :  { %v210_v49 = vpop.permute.xlu0 %209 }
 0x436   :  { %v212_v50 = vmul.f32 %v210_v49, %v195_v39 }
 0x438   :  { %214 = vrot.lane.b32.xlu1 %v212_v50, %s581_s11 }
 0x4aa   :  { %v215_v52 = vpop.permute.xlu1 %214 }
 0x4ab   :  { %530 = vmatmul.msk.f32.vlgmr.msrb.gmra.mxu3 %vm120_vm5, %v215_v52 }
 0x52e   :  { %v235_v58 = vpop.f32.mrf.mxu3 }
 0x52f   :  { %v238_v59 = vadd.f32 %v235_v58, %v96_v57 }
 0x531   :  { %v239_v60 = vmul.f32 %v238_v59, %v678_v14 }
 0x533   :  { %554 = vtanh.f32 %v239_v60 }
 0x539   :  { %v555_v61 = vpop.eup %554 }
 0x53a   :  { %v241_v62 = vmul.f32 %v555_v61, %v678_v14 }
 0x53c   :  { %v242_v63 = vadd.f32 %v241_v62, %v681_v19 }
 0x53e   :  { %245 = vrot.lane.b32.xlu2 %v242_v63, %s580_s3  ;;  %v243_v2 = vmul.f32 %v242_v63, %v206_v44 }
 0x598   :  { %v246_v0 = vpop.permute.xlu2 %245 }
 0x599   :  { %v248_v1 = vmul.f32 %v246_v0, %v242_v63 }
 0x59b   :  { %250 = vrot.lane.b32.xlu0 %v248_v1, %s581_s11 }
 0x60d   :  { %v251_v3 = vpop.permute.xlu0 %250 }
 0x60e   :  { %v253_v4 = vadd.f32 %v251_v3, %v243_v2  ;;  %v108_v2 = vadd.f32 %v675_v10, %v729_v54 }
 0x610   :  { %556 = vtanh.f32 %v253_v4 }
 0x616   :  { %v557_v5 = vpop.eup %556 }
 0x617   :  { %256 = vrot.lane.b32.xlu1 %v557_v5, %s580_s3 }
 0x689   :  { %v257_v7 = vpop.permute.xlu1 %256 }
 0x68a   :  { %v259_v8 = vmul.f32 %v257_v7, %v242_v63 }
 0x68c   :  { %261 = vrot.lane.b32.xlu2 %v259_v8, %s581_s11 }
 0x6e6   :  { %v262_v9 = vpop.permute.xlu2 %261 }
 0x6e7   :  { %531 = vmatmul.msk.f32.vlgmr.msrb.gmra.mxu1 %vm120_vm5, %v262_v9 }
 0x764   :  { %v282_v13 = vpop.f32.mrf.mxu1 }
 0x765   :  { %v285_v15 = vadd.f32 %v282_v13, %v99_v12 }
 0x767   :  { %v286_v16 = vmul.f32 %v285_v15, %v678_v14 }
 0x769   :  { %558 = vtanh.f32 %v286_v16 }
 0x76f   :  { %v559_v17 = vpop.eup %558 }
 0x770   :  { %v288_v18 = vmul.f32 %v559_v17, %v678_v14 }
 0x772   :  { %v289_v20 = vadd.f32 %v288_v18, %v681_v19 }
 0x774   :  { %292 = vrot.lane.b32.xlu0 %v289_v20, %s580_s3  ;;  %v290_v23 = vmul.f32 %v289_v20, %v253_v4 }
 0x7e6   :  { %v293_v21 = vpop.permute.xlu0 %292 }
 0x7e7   :  { %v295_v22 = vmul.f32 %v293_v21, %v289_v20 }
 0x7e9   :  { %297 = vrot.lane.b32.xlu1 %v295_v22, %s581_s11 }
 0x85b   :  { %v298_v24 = vpop.permute.xlu1 %297 }
 0x85c   :  { %v300_v25 = vadd.f32 %v298_v24, %v290_v23 }
 0x85e   :  { %560 = vtanh.f32 %v300_v25 }
 0x864   :  { %v561_v26 = vpop.eup %560 }
 0x865   :  { %303 = vrot.lane.b32.xlu2 %v561_v26, %s580_s3 }
 0x8bf   :  { %v304_v27 = vpop.permute.xlu2 %303 }
 0x8c0   :  { %v306_v28 = vmul.f32 %v304_v27, %v289_v20  ;;  %v111_v20 = vadd.f32 %v675_v10, %v731_v55  ;;  %v544_v10 = vld [vmem:[%s811_s4] ss:$0 sm:$0xff] }
 0x8c2   :  { %308 = vrot.lane.b32.xlu0 %v306_v28, %s581_s11 }
 0x934   :  { %v309_v30 = vpop.permute.xlu0 %308 }
 0x935   :  { %532 = vmatmul.msk.f32.vlgmr.msrb.gmra.mxu2 %vm120_vm5, %v309_v30 }
 0x9b8   :  { %v329_v33 = vpop.f32.mrf.mxu2 }
 0x9b9   :  { %v332_v34 = vadd.f32 %v329_v33, %v102_v32 }
 0x9bb   :  { %v333_v35 = vmul.f32 %v332_v34, %v678_v14  ;;  %v11_v34 = vstv %s812_s5 }
 0x9bc   :  { %12 = vst [vmem:[#allocation2] sm:$0x1] %v11_v34 }
 0x9bd   :  { %562 = vtanh.f32 %v333_v35 }
 0x9c3   :  { %v563_v36 = vpop.eup %562 }
 0x9c4   :  { %v335_v37 = vmul.f32 %v563_v36, %v678_v14 }
 0x9c6   :  { %v336_v38 = vadd.f32 %v335_v37, %v681_v19  ;;  %v545_v37 = vld [vmem:[#allocation2] ss:$0 sm:$0xff] }
 0x9c8   :  { %339 = vrot.lane.b32.xlu1 %v336_v38, %s580_s3  ;;  %v337_v41 = vmul.f32 %v336_v38, %v300_v25 }
 0xa3a   :  { %v340_v39 = vpop.permute.xlu1 %339 }
 0xa3b   :  { %v342_v40 = vmul.f32 %v340_v39, %v336_v38 }
 0xa3d   :  { %344 = vrot.lane.b32.xlu2 %v342_v40, %s581_s11 }
 0xa97   :  { %v345_v42 = vpop.permute.xlu2 %344 }
 0xa98   :  { %v347_v43 = vadd.f32 %v345_v42, %v337_v41 }
 0xa9a   :  { %564 = vtanh.f32 %v347_v43 }
 0xaa0   :  { %v565_v44 = vpop.eup %564 }
 0xaa1   :  { %350 = vrot.lane.b32.xlu0 %v565_v44, %s580_s3 }
 0xb13   :  { %v351_v45 = vpop.permute.xlu0 %350 }
 0xb14   :  { %v353_v46 = vmul.f32 %v351_v45, %v336_v38 }
 0xb16   :  { %355 = vrot.lane.b32.xlu1 %v353_v46, %s581_s11 }
 0xb88   :  { %v356_v47 = vpop.permute.xlu1 %355 }
 0xb89   :  { %533 = vmatmul.msk.f32.vlgmr.msra.gmra.mxu3 %vm120_vm5, %v356_v47 }
 0xc0c   :  { %v376_v49 = vpop.f32.mrf.mxu3 }
 0xc0d   :  { %v379_v50 = vadd.f32 %v376_v49, %v105_v48 }
 0xc0f   :  { %v380_v51 = vmul.f32 %v379_v50, %v678_v14 }
 0xc11   :  { %566 = vtanh.f32 %v380_v51 }
 0xc17   :  { %v567_v52 = vpop.eup %566 }
 0xc18   :  { %v382_v56 = vmul.f32 %v567_v52, %v678_v14 }
 0xc1a   :  { %v383_v57 = vadd.f32 %v382_v56, %v681_v19 }
 0xc1c   :  { %386 = vrot.lane.b32.xlu2 %v383_v57, %s580_s3  ;;  %v384_v60 = vmul.f32 %v383_v57, %v347_v43 }
 0xc76   :  { %v387_v58 = vpop.permute.xlu2 %386 }
 0xc77   :  { %v389_v59 = vmul.f32 %v387_v58, %v383_v57 }
 0xc79   :  { %391 = vrot.lane.b32.xlu0 %v389_v59, %s581_s11 }
 0xceb   :  { %v392_v61 = vpop.permute.xlu0 %391 }
 0xcec   :  { %v394_v62 = vadd.f32 %v392_v61, %v384_v60 }
 0xcee   :  { %568 = vtanh.f32 %v394_v62 }
 0xcf4   :  { %v569_v53 = vpop.eup %568 }
 0xcf5   :  { %397 = vrot.lane.b32.xlu1 %v569_v53, %s580_s3 }
 0xd67   :  { %v398_v63 = vpop.permute.xlu1 %397 }
 0xd68   :  { %v400_v0 = vmul.f32 %v398_v63, %v383_v57 }
 0xd6a   :  { %402 = vrot.lane.b32.xlu2 %v400_v0, %s581_s11 }
 0xdc4   :  { %v403_v1 = vpop.permute.xlu2 %402 }
 0xdc5   :  { %534 = vmatmul.msk.f32.vlgmr.msra.gmra.mxu1 %vm120_vm5, %v403_v1 }
 0xe42   :  { %v423_v3 = vpop.f32.mrf.mxu1 }
 0xe43   :  { %v426_v4 = vadd.f32 %v423_v3, %v108_v2 }
 0xe45   :  { %v427_v5 = vmul.f32 %v426_v4, %v678_v14 }
 0xe47   :  { %570 = vtanh.f32 %v427_v5 }
 0xe4d   :  { %v571_v6 = vpop.eup %570 }
 0xe4e   :  { %v429_v7 = vmul.f32 %v571_v6, %v678_v14 }
 0xe50   :  { %v430_v8 = vadd.f32 %v429_v7, %v681_v19 }
 0xe52   :  { %433 = vrot.lane.b32.xlu0 %v430_v8, %s580_s3  ;;  %v431_v12 = vmul.f32 %v430_v8, %v394_v62 }
 0xec4   :  { %v434_v9 = vpop.permute.xlu0 %433 }
 0xec5   :  { %v436_v11 = vmul.f32 %v434_v9, %v430_v8 }
 0xec7   :  { %438 = vrot.lane.b32.xlu1 %v436_v11, %s581_s11 }
 0xf39   :  { %v439_v13 = vpop.permute.xlu1 %438 }
 0xf3a   :  { %v441_v15 = vadd.f32 %v439_v13, %v431_v12 }
 0xf3c   :  { %572 = vtanh.f32 %v441_v15 }
 0xf42   :  { %v573_v54 = vpop.eup %572 }
 0xf43   :  { %444 = vrot.lane.b32.xlu2 %v573_v54, %s580_s3 }
 0xf9d   :  { %v445_v16 = vpop.permute.xlu2 %444 }
 0xf9e   :  { %v447_v17 = vmul.f32 %v445_v16, %v430_v8 }
 0xfa0   :  { %449 = vrot.lane.b32.xlu0 %v447_v17, %s581_s11 }
0x1012   :  { %v450_v18 = vpop.permute.xlu0 %449 }
0x1013   :  { %535 = vmatmul.msk.f32.vlgmr.msra.gmra.mxu2 %vm120_vm5, %v450_v18 }
0x1096   :  { %v470_v21 = vpop.f32.mrf.mxu2 }
0x1097   :  { %v473_v22 = vadd.f32 %v470_v21, %v111_v20 }
0x1099   :  { %v474_v23 = vmul.f32 %v473_v22, %v678_v14 }
0x109b   :  { %574 = vtanh.f32 %v474_v23 }
0x10a1   :  { %v575_v24 = vpop.eup %574 }
0x10a2   :  { %v476_v25 = vmul.f32 %v575_v24, %v678_v14 }
0x10a4   :  { %v477_v26 = vadd.f32 %v476_v25, %v681_v19 }
0x10a6   :  { %480 = vrot.lane.b32.xlu1 %v477_v26, %s580_s3  ;;  %v478_v55 = vmul.f32 %v477_v26, %v441_v15 }
0x10ae   :  { %498 = vrot.lane.b32.xlu1 %v544_v10, %s582_s27 }
0x1118   :  { %v481_v27 = vpop.permute.xlu1 %480 }
0x1119   :  { %v483_v28 = vmul.f32 %v481_v27, %v477_v26 }
0x111b   :  { %485 = vrot.lane.b32.xlu2 %v483_v28, %s581_s11 }
0x1120   :  { %v499_v19 = vpop.permute.xlu1 %498 }
0x1175   :  { %v486_v29 = vpop.permute.xlu2 %485 }
0x1176   :  { %v488_v30 = vadd.f32 %v486_v29, %v478_v55 }
0x1178   :  { %576 = vtanh.f32 %v488_v30 }
0x117e   :  { %v577_v31 = vpop.eup %576 }
0x117f   :  { %491 = vrot.lane.b32.xlu0 %v577_v31, %s580_s3 }
0x11f1   :  { %v492_v14 = vpop.permute.xlu0 %491 }
0x11f2   :  { %v494_v32 = vmul.f32 %v492_v14, %v477_v26 }
0x11f4   :  { %v501_v33 = vmul.f32 %v499_v19, %v494_v32 }
0x11f6   :  { %503 = vrot.lane.b32.xlu2 %v501_v33, %s581_s11 }
0x1250   :  { %v504_v35 = vpop.permute.xlu2 %503 }
0x1251   :  { %v506_v36 = vsel %vm120_vm5, %v504_v35, 0.0 }
0x1252   :  { %507 = vadd.xlane.f32.xlu0 %v506_v36 }
0x12c5   :  { %v508_v38 = vpop.xlane.xlu0 %507 }
0x12c6   :  { %v513_v39 = vadd.f32 %v545_v37, %v508_v38 }
0x12c8   :  { %515 = vst.msk [vmem:[%s813_s6] sm:$0xff] %vm514_vm6, %v513_v39 }

</bundles_post_ra>
